<compile_context>
chip_gen: v7x
topology: tpu7x:2x2x1
jax: 0.10.0
libtpu: 0.0.40
codegen_flags: <defaults>
</compile_context>

<pallas_src>
import functools
import math

import jax
import jax.numpy as jnp
from jax.experimental import pallas as pl
from jax.experimental.pallas import tpu as pltpu

_LANE = 128
_SUB = 8
_TILE_R = 8192            # rows per block -> 4 MiB per f32 input block
_VMEM_LIMIT = 32 << 20    # >= actual use (~17 MiB), <= physical on all gens


def _bce_elem_loss(p, t):
    """Per-element BCE with PyTorch's log clamp at -100 (f32 math)."""
    p = p.astype(jnp.float32)
    t = t.astype(jnp.float32)
    log_p = jnp.maximum(jnp.log(p), -100.0)
    log_1mp = jnp.maximum(jnp.log(1.0 - p), -100.0)
    return -(t * log_p + (1.0 - t) * log_1mp)


def _bce_kernel(pred_ref, tgt_ref, out_ref, acc_ref, *, tile_r, valid_last_rows):
    j = pl.program_id(0)
    nb = pl.num_programs(0)

    @pl.when(j == 0)
    def _():
        acc_ref[...] = jnp.zeros_like(acc_ref)

    loss = _bce_elem_loss(pred_ref[...], tgt_ref[...])   # (tile_r, 128) f32

    def fold(x):
        # Pure-VPU fold of a (tile_r, 128) tile into the (8, 128) accumulator.
        return x.reshape(tile_r // _SUB, _SUB, _LANE).sum(axis=0)

    if valid_last_rows == tile_r:
        # Every block is full: no masking anywhere.
        acc_ref[...] += fold(loss)
    else:
        @pl.when(j < nb - 1)
        def _():
            acc_ref[...] += fold(loss)

        @pl.when(j == nb - 1)
        def _():
            # Partial last block: mask garbage rows (jnp.where is a true
            # select, so NaNs from undefined rows never propagate).
            row = jax.lax.broadcasted_iota(jnp.int32, (tile_r, 1), 0)
            acc_ref[...] += fold(jnp.where(row < valid_last_rows, loss, 0.0))

    @pl.when(j == nb - 1)
    def _():
        out_ref[...] = acc_ref[...]


def bce_loss(pred, target, *, max_tile_rows=_TILE_R):
    """Mean binary cross-entropy over all elements (matches nn.BCELoss()).

    Intended fast path: bf16 pred/target for large tensors (kernel upcasts
    per tile).  Returns f32.
    """
    assert pred.shape == target.shape
    assert max_tile_rows % _SUB == 0
    total = int(math.prod(pred.shape))
    assert total > 0

    p_flat = pred.reshape(-1)
    t_flat = target.reshape(-1)

    blk = _SUB * _LANE                      # 1024
    aligned = (total // blk) * blk          # largest 1024-aligned prefix
    rows = aligned // _LANE                 # multiple of 8

    # Tail (< 1024 elements), only in the ragged case: tiny jnp reduction,
    # no pad / full-array copy.
    if aligned == total:
        tail_sum = jnp.float32(0.0)
    else:
        tail_sum = jnp.sum(_bce_elem_loss(p_flat[aligned:], t_flat[aligned:]))

    kernel_sum = jnp.float32(0.0)
    if rows > 0:
        p_main = p_flat if aligned == total else p_flat[:aligned]
        t_main = t_flat if aligned == total else t_flat[:aligned]
        p2 = p_main.reshape(rows, _LANE)
        t2 = t_main.reshape(rows, _LANE)

        tile_r = min(max_tile_rows, rows)           # multiple of 8
        nb = -(-rows // tile_r)
        valid_last_rows = rows - (nb - 1) * tile_r  # == tile_r iff all full

        itemsize = jnp.dtype(p2.dtype).itemsize
        out = pl.pallas_call(
            functools.partial(
                _bce_kernel, tile_r=tile_r, valid_last_rows=valid_last_rows),
            out_shape=jax.ShapeDtypeStruct((_SUB, _LANE), jnp.float32),
            grid_spec=pltpu.PrefetchScalarGridSpec(
                num_scalar_prefetch=0,
                grid=(nb,),
                in_specs=[
                    pl.BlockSpec((tile_r, _LANE), lambda j: (j, 0)),
                    pl.BlockSpec((tile_r, _LANE), lambda j: (j, 0)),
                ],
                out_specs=pl.BlockSpec((_SUB, _LANE), lambda j: (0, 0)),
                scratch_shapes=[pltpu.VMEM((_SUB, _LANE), jnp.float32)],
            ),
            compiler_params=pltpu.CompilerParams(
                dimension_semantics=("arbitrary",),
                vmem_limit_bytes=_VMEM_LIMIT,
            ),
            cost_estimate=pl.CostEstimate(
                flops=6 * aligned,
                transcendentals=2 * aligned,
                bytes_accessed=2 * aligned * itemsize + _SUB * _LANE * 4,
            ),
        )(p2, t2)
        kernel_sum = jnp.sum(out, dtype=jnp.float32)

    return (kernel_sum + tail_sum) / jnp.float32(total)


def _bce_ref(pred, target):
    return jnp.mean(_bce_elem_loss(pred, target))


if __name__ == "__main__":
    key = jax.random.PRNGKey(0)
    k1, k2, k3, k4, k5, k6 = jax.random.split(key, 6)

    # 1) Aligned fast path (total % 1024 == 0): NCHW, like the PyTorch module.
    shape = (2, 4, 16, 16)
    pred = jax.nn.sigmoid(jax.random.normal(k1, shape, dtype=jnp.float32))
    target = (jax.random.uniform(k2, shape) > 0.5).astype(jnp.float32)
    out = bce_loss(pred, target)
    jax.block_until_ready(out)
    ref = _bce_ref(pred, target)
    assert jnp.allclose(out, ref, rtol=1e-5, atol=1e-5), (out, ref)

    # 2) Ragged path (total % 1024 != 0): tail reduced without any pad copy.
    shape2 = (2, 3, 7, 5)
    pred2 = jax.nn.sigmoid(jax.random.normal(k3, shape2, dtype=jnp.float32))
    target2 = (jax.random.uniform(k4, shape2) > 0.5).astype(jnp.float32)
    out2 = bce_loss(pred2, target2)
    jax.block_until_ready(out2)
    ref2 = _bce_ref(pred2, target2)
    assert jnp.allclose(out2, ref2, rtol=1e-5, atol=1e-5), (out2, ref2)

    # 3) Multi-block + partial last block (exercises the predicated row mask)
    #    by capping the tile at 16 rows on a 24-row input.
    shape3 = (3, 4, 16, 16)
    pred3 = jax.nn.sigmoid(jax.random.normal(k5, shape3, dtype=jnp.float32))
    target3 = (jax.random.uniform(k6, shape3) > 0.5).astype(jnp.float32)
    out3 = bce_loss(pred3, target3, max_tile_rows=16)
    jax.block_until_ready(out3)
    ref3 = _bce_ref(pred3, target3)
    assert jnp.allclose(out3, ref3, rtol=1e-5, atol=1e-5), (out3, ref3)

    print("KERNEL_OK")
</pallas_src>

<mosaic_0001>
module attributes {stable_mosaic.version = 11 : i64} {
  func.func @_bce_kernel(%arg0: i32, %arg1: memref<16x128xf32, #tpu.memory_space<vmem>>, %arg2: memref<16x128xf32, #tpu.memory_space<vmem>>, %arg3: memref<8x128xf32, #tpu.memory_space<vmem>>, %arg4: memref<8x128xf32, #tpu.memory_space<vmem>>) attributes {dimension_semantics = [#tpu.dimension_semantics<arbitrary>], iteration_bounds = array<i64: 1>, scalar_prefetch = 0 : i64, scratch_operands = 1 : i64, tpu.core_type = #tpu.core_type<tc>, window_params = [{transform_indices = @transform_0, window_bounds = array<i64: 16, 128>}, {transform_indices = @transform_1, window_bounds = array<i64: 16, 128>}, {pipeline_mode = #tpu.pipeline_mode<synchronous>, transform_indices = @transform_2, window_bounds = array<i64: 8, 128>}]} {
    %c0_i32 = arith.constant 0 : i32
    %0 = arith.cmpi eq, %arg0, %c0_i32 : i32
    %1 = arith.extui %0 : i1 to i32
    %c0_i32_0 = arith.constant 0 : i32
    %2 = arith.cmpi ne, %1, %c0_i32_0 : i32
    scf.if %2 {
      %cst_15 = arith.constant 0.000000e+00 : f32
      %28 = vector.broadcast %cst_15 : f32 to vector<8x128xf32>
      %c0_16 = arith.constant 0 : index
      %c0_17 = arith.constant 0 : index
      %29 = vector.load %arg4[%c0_16, %c0_17] : memref<8x128xf32, #tpu.memory_space<vmem>>, vector<8x128xf32>
      tpu.vector_store %arg4[%c0_16, %c0_17], %28 {strides = array<i32>} : memref<8x128xf32, #tpu.memory_space<vmem>>, vector<8x128xf32>,
    } else {
    }
    %c0 = arith.constant 0 : index
    %c0_1 = arith.constant 0 : index
    %3 = vector.load %arg1[%c0, %c0_1] : memref<16x128xf32, #tpu.memory_space<vmem>>, vector<16x128xf32>
    %c0_2 = arith.constant 0 : index
    %c0_3 = arith.constant 0 : index
    %4 = vector.load %arg2[%c0_2, %c0_3] : memref<16x128xf32, #tpu.memory_space<vmem>>, vector<16x128xf32>
    %5 = math.log %3 : vector<16x128xf32>
    %cst = arith.constant -1.000000e+02 : f32
    %6 = vector.broadcast %cst : f32 to vector<16x128xf32>
    %7 = arith.maximumf %5, %6 : vector<16x128xf32>
    %cst_4 = arith.constant 1.000000e+00 : f32
    %8 = vector.broadcast %cst_4 : f32 to vector<16x128xf32>
    %9 = arith.subf %8, %3 : vector<16x128xf32>
    %10 = math.log %9 : vector<16x128xf32>
    %cst_5 = arith.constant -1.000000e+02 : f32
    %11 = vector.broadcast %cst_5 : f32 to vector<16x128xf32>
    %12 = arith.maximumf %10, %11 : vector<16x128xf32>
    %13 = arith.mulf %4, %7 : vector<16x128xf32>
    %cst_6 = arith.constant 1.000000e+00 : f32
    %14 = vector.broadcast %cst_6 : f32 to vector<16x128xf32>
    %15 = arith.subf %14, %4 : vector<16x128xf32>
    %16 = arith.mulf %15, %12 : vector<16x128xf32>
    %17 = arith.addf %13, %16 : vector<16x128xf32>
    %cst_7 = arith.constant 0.000000e+00 : f32
    %18 = vector.broadcast %cst_7 : f32 to vector<16x128xf32>
    %19 = arith.subf %18, %17 : vector<16x128xf32>
    %c0_8 = arith.constant 0 : index
    %c0_9 = arith.constant 0 : index
    %20 = vector.load %arg4[%c0_8, %c0_9] : memref<8x128xf32, #tpu.memory_space<vmem>>, vector<8x128xf32>
    %21 = vector.shape_cast %19 : vector<16x128xf32> to vector<2x8x128xf32>
    %cst_10 = arith.constant dense<0.000000e+00> : vector<8x128xf32>
    %22 = vector.multi_reduction <add>, %21, %cst_10 [0] : vector<2x8x128xf32> to vector<8x128xf32>
    %23 = arith.addf %20, %22 : vector<8x128xf32>
    %c0_11 = arith.constant 0 : index
    %c0_12 = arith.constant 0 : index
    %24 = vector.load %arg4[%c0_11, %c0_12] : memref<8x128xf32, #tpu.memory_space<vmem>>, vector<8x128xf32>
    tpu.vector_store %arg4[%c0_11, %c0_12], %23 {strides = array<i32>} : memref<8x128xf32, #tpu.memory_space<vmem>>, vector<8x128xf32>,
    %c0_i32_13 = arith.constant 0 : i32
    %25 = arith.cmpi eq, %arg0, %c0_i32_13 : i32
    %26 = arith.extui %25 : i1 to i32
    %c0_i32_14 = arith.constant 0 : i32
    %27 = arith.cmpi ne, %26, %c0_i32_14 : i32
    scf.if %27 {
      %c0_15 = arith.constant 0 : index
      %c0_16 = arith.constant 0 : index
      %28 = vector.load %arg4[%c0_15, %c0_16] : memref<8x128xf32, #tpu.memory_space<vmem>>, vector<8x128xf32>
      %c0_17 = arith.constant 0 : index
      %c0_18 = arith.constant 0 : index
      %29 = vector.load %arg3[%c0_17, %c0_18] : memref<8x128xf32, #tpu.memory_space<vmem>>, vector<8x128xf32>
      tpu.vector_store %arg3[%c0_17, %c0_18], %28 {strides = array<i32>} : memref<8x128xf32, #tpu.memory_space<vmem>>, vector<8x128xf32>,
    } else {
    }
    return
  }
  func.func @transform_0(%arg0: i32) -> (i32, i32) {
    %c0_i32 = arith.constant 0 : i32
    %c0_i32_0 = arith.constant 0 : i32
    return %arg0, %c0_i32 : i32, i32
  }
  func.func @transform_1(%arg0: i32) -> (i32, i32) {
    %c0_i32 = arith.constant 0 : i32
    %c0_i32_0 = arith.constant 0 : i32
    return %arg0, %c0_i32 : i32, i32
  }
  func.func @transform_2(%arg0: i32) -> (i32, i32) {
    %c0_i32 = arith.constant 0 : i32
    %c0_i32_0 = arith.constant 0 : i32
    %c0_i32_1 = arith.constant 0 : i32
    return %c0_i32, %c0_i32_0 : i32, i32
  }
}

</mosaic_0001>

<bundles_post_ra>
// kernel: tpu_custom_call.1
= control target key start
LH: loop header
LB: loop body
LE: loop exit
PB: predicated region body
PF: predicated region fallthrough
CT: control target
= control target key end

     0   :  { %7 = vsyncpa [#allocation4], 0  ;;  %s239_s0 = inlined_call_operand.hbm [shape: f32[16,128], index: 0, kind: input, shape index: {}]   ;;  %s240_s1 = inlined_call_operand.hbm [shape: f32[16,128], index: 1, kind: input, shape index: {}]   ;;  %s241_s2 = inlined_call_operand.hbm [shape: f32[8,128], index: 2, kind: output, shape index: {}]  }
   0x1   :  { %8 = vsyncpa [#allocation7], 0 }
   0x2   :  { %9 = vsyncpa [#allocation5], 0  ;;  %s183_s9 = smov [#allocation3]   ;;  %s111_s13 = scalar_lea.hbm %s239_s0, 256 }
   0x3   :  { %s15_s10 = sshll.u32 %s183_s9, 4  ;;  %p112_p0 = scmp.ne.s32.totalorder %s239_s0, %s111_s13  ;;  %s16_s10 = int_to_ptr.vmem [resolvable:$true] %s15_s10 }
   0x4   :  { %p115_p1 = scmp.lt.u32.totalorder %s111_s13, %s239_s0 }
   0x6   :  { %p117_p2 = pnand %p115_p1, %p112_p0 }
   0x8   :  { %120 = shalt.err (!%p117_p2)
}
   0x9   :  { %s121_s18 = scalar_lea.vmem %s16_s10, 256  ;;  %p126_p4 = scmp.lt.s32.totalorder %s16_s10, %s16_s10 }
   0xa   :  { %p122_p3 = scmp.ne.s32.totalorder %s16_s10, %s121_s18  ;;  %p127_p5 = scmp.lt.s32.totalorder %s121_s18, %s121_s18 }
   0xc   :  { %p128_p6 = por %p127_p5, %p126_p4 }
   0xe   :  { %p129_p7 = pnand %p128_p6, %p122_p3 }
  0x10   :  { %132 = shalt.err (!%p129_p7)
}
  0x11   :  { %s184_s19 = smov 128   ;;  %s185_s20 = smov 8  }
  0x12   :  { %21 = dma.hbm_to_vmem [thread:$0]  %s239_s0, 256, %s16_s10, [#allocation4], %s184_s19, %s184_s19, %s185_s20  }
  0x13   :  { %s186_s23 = smov [#allocation6]   ;;  %s133_s27 = scalar_lea.hbm %s240_s1, 256 }
  0x14   :  { %s27_s24 = sshll.u32 %s186_s23, 4  ;;  %p134_p8 = scmp.ne.s32.totalorder %s240_s1, %s133_s27  ;;  %s28_s24 = int_to_ptr.vmem [resolvable:$true] %s27_s24 }
  0x15   :  { %p137_p9 = scmp.lt.u32.totalorder %s133_s27, %s240_s1 }
  0x17   :  { %p139_p10 = pnand %p137_p9, %p134_p8 }
  0x19   :  { %142 = shalt.err (!%p139_p10)
}
  0x1a   :  { %s143_s4 = scalar_lea.vmem %s28_s24, 256  ;;  %p148_p12 = scmp.lt.s32.totalorder %s28_s24, %s28_s24 }
  0x1b   :  { %p144_p11 = scmp.ne.s32.totalorder %s28_s24, %s143_s4  ;;  %p149_p13 = scmp.lt.s32.totalorder %s143_s4, %s143_s4 }
  0x1d   :  { %p150_p0 = por %p149_p13, %p148_p12 }
  0x1f   :  { %p151_p1 = pnand %p150_p0, %p144_p11 }
  0x21   :  { %154 = shalt.err (!%p151_p1)
}
  0x22   :  { %33 = dma.hbm_to_vmem [thread:$0]  %s240_s1, 256, %s28_s24, [#allocation7], %s184_s19, %s184_s19, %s185_s20  }
  0x23   :  { %177 = dma.done.wait [#allocation4], 256  }
  0x24   :  { %178 = vsyncadd [#allocation4], 4294967040 }
  0x25   :  { %179 = dma.done.wait [#allocation7], 256  }
  0x26   :  { %180 = vsyncadd [#allocation7], 4294967040  ;;  %v45_v0 = vld [vmem:[#allocation3] sm:$0xff]  ;;  %v46_v1 = vld [vmem:[#allocation3 + $0x8] sm:$0xff]  ;;  %s187_s1 = smov [#allocation8]  }
  0x27   :  { %103 = vlog2.f32 %v45_v0  ;;  %v55_v2 = vsub.f32 1.0, %v45_v0  ;;  %v56_v3 = vsub.f32 1.0, %v46_v1  ;;  %v47_v5 = vld [vmem:[#allocation6] sm:$0xff]  ;;  %v48_v7 = vld [vmem:[#allocation6 + $0x8] sm:$0xff]  ;;  %s88_s6 = sshll.u32 %s187_s1, 4  ;;  %s89_s6 = int_to_ptr.vmem [resolvable:$true] %s88_s6 }
  0x28   :  { %105 = vlog2.f32 %v46_v1  ;;  %v65_v14 = vsub.f32 1.0, %v47_v5  ;;  %v66_v17 = vsub.f32 1.0, %v48_v7  ;;  %s155_s7 = scalar_lea.vmem %s89_s6, 128  ;;  %p160_p3 = scmp.lt.s32.totalorder %s89_s6, %s89_s6 }
  0x29   :  { %107 = vlog2.f32 %v55_v2  ;;  %p156_p2 = scmp.ne.s32.totalorder %s89_s6, %s155_s7  ;;  %p161_p4 = scmp.lt.s32.totalorder %s155_s7, %s155_s7 }
  0x2a   :  { %109 = vlog2.f32 %v56_v3 }
  0x2b   :  { %p162_p5 = por %p161_p4, %p160_p3 }
  0x2d   :  { %p163_p6 = pnand %p162_p5, %p156_p2 }
  0x31   :  { %v104_v4 = vpop.eup %103 }
  0x32   :  { %v106_v6 = vpop.eup %105  ;;  %v50_v8 = vmul.f32 0.6931472, %v104_v4 }
  0x33   :  { %v108_v9 = vpop.eup %107  ;;  %v52_v10 = vmul.f32 0.6931472, %v106_v6 }
  0x34   :  { %v110_v11 = vpop.eup %109  ;;  %v53_v12 = vmax.f32 %v50_v8, -100.0  ;;  %v58_v13 = vmul.f32 0.6931472, %v108_v9 }
  0x35   :  { %v54_v15 = vmax.f32 %v52_v10, -100.0  ;;  %v60_v16 = vmul.f32 0.6931472, %v110_v11 }
  0x36   :  { %v61_v18 = vmax.f32 %v58_v13, -100.0  ;;  %v63_v19 = vmul.f32 %v53_v12, %v47_v5 }
  0x37   :  { %v62_v20 = vmax.f32 %v60_v16, -100.0  ;;  %v64_v21 = vmul.f32 %v54_v15, %v48_v7 }
  0x38   :  { %v67_v22 = vmul.f32 %v65_v14, %v61_v18 }
  0x39   :  { %v68_v23 = vmul.f32 %v66_v17, %v62_v20 }
  0x3a   :  { %v69_v24 = vadd.f32 %v67_v22, %v63_v19 }
  0x3b   :  { %v70_v25 = vadd.f32 %v68_v23, %v64_v21 }
  0x3c   :  { %v71_v26 = vsub.f32 0.0, %v69_v24 }
  0x3d   :  { %v72_v27 = vsub.f32 0.0, %v70_v25 }
  0x3f   :  { %v74_v28 = vadd.f32 %v72_v27, %v71_v26 }
  0x41   :  { %81 = vst [vmem:[#allocation8] sm:$0xff] %v74_v28 }
  0x42   :  { %166 = shalt.err (!%p163_p6)
}
  0x43   :  { %s167_s10 = scalar_lea.hbm %s241_s2, 128 }
  0x44   :  { %p168_p7 = scmp.ne.s32.totalorder %s241_s2, %s167_s10  ;;  %p171_p8 = scmp.lt.u32.totalorder %s167_s10, %s241_s2 }
  0x46   :  { %p173_p9 = pnand %p171_p8, %p168_p7 }
  0x48   :  { %176 = shalt.err (!%p173_p9)
}
  0x49   :  { %91 = dma.vmem_to_hbm [thread:$0]  %s89_s6, 128, %s241_s2, [#allocation5]  }
  0x4a   :  { %181 = dma.done.wait [#allocation5], 128  }
  0x4b   :  { %182 = vsyncadd [#allocation5], 4294967168 }
  0x4c   :  { %95 = vsyncpa [#allocation4], 1 }
  0x4d   :  { %96 = vsyncpa [#allocation7], 1 }
  0x4e   :  { %97 = vsyncpa [#allocation5], 1 }

</bundles_post_ra>
